<compile_context>
chip_gen: v7x
topology: tpu7x:2x2x1
jax: 0.10.0
libtpu: 0.0.40
codegen_flags: <defaults>
</compile_context>

<pallas_src>
import jax
import jax.numpy as jnp
from jax.experimental import pallas as pl
from jax.experimental.pallas import tpu as pltpu

INPUT = 1       # input_size (DeepLog uses 1)
HIDDEN = 32     # hidden_size
LAYERS = 2      # num_layers
KEYS = 16       # num_keys


def deeplog_kernel(x_ref,      # (B, T)     raw input sequence (INPUT=1 squeezed)
                   wx_ref,     # (1, 8H)    layer-0 input weights, permuted; layer-1 cols zero
                   bb_ref,     # (1, 8H)    combined biases [b0 | b1], permuted
                   wbig_ref,   # (2H, 8H)   block-structured recurrent weights
                   wfc_ref,    # (H, K)     fc weights
                   bfc_ref,    # (1, K)     fc bias
                   out_ref):   # (B, K)
    B, T = x_ref.shape
    H2, _ = wbig_ref.shape
    H = H2 // 2

    # Hoist all weight/bias loads out of the recurrence (a few dozen vregs).
    wbig = wbig_ref[...]
    wx = wx_ref[...]
    bb = bb_ref[...]
    x_all = x_ref[...]                                   # (B, T)

    def gate_base(t):
        # Per-wave additive gate term: layer-0 gate columns get x_t@Wih0 + b0
        # (INPUT=1 -> lane broadcast multiply), layer-1 columns get b1.  Depends
        # only on x / weights, so it sits off the serial recurrence chain.
        return x_all[:, t:t + 1] * wx + bb               # (B,1)*(1,8H)+(1,8H) -> (B,8H)

    def wave_act(gates, c_prev):
        # One EUP sigmoid push over the full (B, 8H) gate tile; g-gates use the
        # identity tanh(x) = 2*sigmoid(2x) - 1 (their columns were pre-scaled
        # x2), so the only other transcendental is one tanh on the new cell.
        sg = jax.nn.sigmoid(gates)
        i = sg[:, 0 * H:2 * H]                           # [i0 | i1]
        f = sg[:, 2 * H:4 * H]                           # [f0 | f1]
        g = 2.0 * sg[:, 4 * H:6 * H] - 1.0               # [g0 | g1] == tanh
        o = sg[:, 6 * H:8 * H]                           # [o0 | o1]
        c_new = f * c_prev + i * g
        h_new = o * jnp.tanh(c_new)
        return h_new, c_new

    # Lane mask selecting the layer-0 half of the (B, 2H) state tile.
    lane = jax.lax.broadcasted_iota(jnp.int32, (1, 2 * H), 1)
    m0 = (lane < H).astype(jnp.float32)

    # Wave 0 (peeled): every state is zero -> no matmul.  Only the layer-0 half
    # of the result is real; the layer-1 half is masked back to zero.
    h_cat, c_cat = wave_act(gate_base(0), jnp.zeros((B, 2 * H), jnp.float32))
    h_cat = h_cat * m0
    c_cat = c_cat * m0

    # Waves 1..T-1: layer-0 step w and layer-1 step w-1 together.  h_cat/c_cat
    # hold [h0 | h1] / [c0 | c1]; one (B,2H)@(2H,8H) MXU push produces both
    # cells' recurrent gate contributions (bottom-left weight block is zero,
    # so h1 never leaks into layer-0's gates).
    for w in range(1, T):
        gates = gate_base(w) + jnp.dot(h_cat, wbig,
                                       preferred_element_type=jnp.float32)
        h_cat, c_cat = wave_act(gates, c_cat)

    # Wave T: layer-1's final step only (there is no x[T]); the layer-0 half of
    # this wave is junk and discarded.
    gates = bb + jnp.dot(h_cat, wbig, preferred_element_type=jnp.float32)
    h_last, _ = wave_act(gates, c_cat)
    h1 = h_last[:, H:2 * H]                              # top-layer hidden at t = T-1

    # fc(out[:, -1, :]) == fc(top-layer hidden at the last timestep)
    out_ref[...] = (jnp.dot(h1, wfc_ref[...], preferred_element_type=jnp.float32)
                    + bfc_ref[...])


def prepare_params(params):
    """One-time repack of the (in, out) weights into the wavefront layout.

    Gate columns are permuted to [i0 i1 f0 f1 g0 g1 o0 o1] (cell 0 = LSTM layer
    0, cell 1 = LSTM layer 1) and every g-gate column is pre-scaled by 2 so the
    kernel can use tanh(x) = 2*sigmoid(2x) - 1.
    """
    wih0, whh0, b0, wih1, whh1, b1, wfc, bfc = params
    H = HIDDEN

    def gate_blocks(w):
        blocks = [w[..., k * H:(k + 1) * H] for k in range(4)]   # i, f, g, o
        blocks[2] = 2.0 * blocks[2]                              # pre-scale g
        return blocks

    def interleave(blocks0, blocks1):
        out = []
        for a, b in zip(blocks0, blocks1):
            out.extend([a, b])
        return jnp.concatenate(out, axis=-1)                     # (..., 8H)

    zeros_hh = [jnp.zeros((H, H), jnp.float32)] * 4
    zeros_ih = [jnp.zeros((1, H), jnp.float32)] * 4

    # Rows 0:H of w_big multiply h0, rows H:2H multiply h1.
    w_top = interleave(gate_blocks(whh0), gate_blocks(wih1))     # (H, 8H)
    w_bot = interleave(zeros_hh, gate_blocks(whh1))              # (H, 8H)
    w_big = jnp.concatenate([w_top, w_bot], axis=0)              # (2H, 8H)

    wx_big = interleave(gate_blocks(wih0), zeros_ih)             # (1, 8H)
    b_big = interleave(gate_blocks(b0), gate_blocks(b1))         # (1, 8H)

    return wx_big, b_big, w_big, wfc, bfc


def deeplog_forward(x, prepared):
    """x: (B, T, INPUT) float32 (PyTorch batch_first layout).

    `prepared` must come from prepare_params(); the per-call wrapper does no
    data-path work beyond a metadata-only reshape of x.
    """
    wx_big, b_big, w_big, wfc, bfc = prepared
    B, T, I = x.shape
    assert I == INPUT
    x2 = x.reshape(B, T)   # drop the trailing size-1 dim (metadata-only reshape)

    vmem = lambda: pl.BlockSpec(memory_space=pltpu.MemorySpace.VMEM)
    return pl.pallas_call(
        deeplog_kernel,
        out_shape=jax.ShapeDtypeStruct((B, KEYS), jnp.float32),
        in_specs=[vmem() for _ in range(6)],
        out_specs=vmem(),
    )(x2, wx_big, b_big, w_big, wfc, bfc)
    # TODO(synk): for serving batches (B >= 16) add a leading batch grid with
    # dimension_semantics=("parallel",) so v7x's two TensorCores split the batch.
    # TODO(synk): on v5e, casting h_cat / w_big to bfloat16 (f32 accumulation)
    # would cut MXU pass count, but must be re-validated against the 1e-4
    # tolerance over the 8-step recurrence.


def reference_forward(x, wih0, whh0, b0, wih1, whh1, b1, wfc, bfc):
    """Pure-JAX reference matching torch.nn.LSTM + Linear."""
    B, T, _ = x.shape
    H = HIDDEN
    h = [jnp.zeros((B, H), jnp.float32) for _ in range(LAYERS)]
    c = [jnp.zeros((B, H), jnp.float32) for _ in range(LAYERS)]

    def cell(xt, hp, cp, wih, whh, b):
        g = xt @ wih + hp @ whh + b
        i = jax.nn.sigmoid(g[:, :H])
        f = jax.nn.sigmoid(g[:, H:2 * H])
        gg = jnp.tanh(g[:, 2 * H:3 * H])
        o = jax.nn.sigmoid(g[:, 3 * H:])
        cn = f * cp + i * gg
        return o * jnp.tanh(cn), cn

    for t in range(T):
        xt = x[:, t, :]
        h[0], c[0] = cell(xt, h[0], c[0], wih0, whh0, b0)
        h[1], c[1] = cell(h[0], h[1], c[1], wih1, whh1, b1)
    return h[1] @ wfc + bfc


if __name__ == "__main__":
    B, T = 4, 8
    key = jax.random.PRNGKey(0)
    ks = jax.random.split(key, 9)
    scale = 1.0 / float(jnp.sqrt(HIDDEN))

    def u(k, shape):
        return jax.random.uniform(k, shape, jnp.float32, -scale, scale)

    # Deterministic synthetic params (PyTorch-style uniform(-1/sqrt(H), 1/sqrt(H))).
    # Biases combine b_ih + b_hh into a single (1, 4H) term; weights are (in, out).
    wih0 = u(ks[0], (INPUT, 4 * HIDDEN))
    whh0 = u(ks[1], (HIDDEN, 4 * HIDDEN))
    b0 = u(ks[2], (1, 4 * HIDDEN))
    wih1 = u(ks[3], (HIDDEN, 4 * HIDDEN))
    whh1 = u(ks[4], (HIDDEN, 4 * HIDDEN))
    b1 = u(ks[5], (1, 4 * HIDDEN))
    wfc = u(ks[6], (HIDDEN, KEYS))
    bfc = u(ks[7], (1, KEYS))
    params = (wih0, whh0, b0, wih1, whh1, b1, wfc, bfc)

    x = jax.random.normal(ks[8], (B, T, INPUT), jnp.float32)

    prepared = prepare_params(params)   # one-time weight repack (off the per-call path)

    out = deeplog_forward(x, prepared)
    jax.block_until_ready(out)

    ref = reference_forward(x, *params)
    assert out.shape == (B, KEYS)
    assert jnp.allclose(out, ref, atol=1e-4, rtol=1e-4), "kernel mismatch vs reference"
    print("KERNEL_OK")
</pallas_src>

<mosaic_0001>
module attributes {stable_mosaic.version = 11 : i64} {
  func.func @deeplog_kernel(%arg0: memref<4x8xf32, #tpu.memory_space<vmem>>, %arg1: memref<1x256xf32, #tpu.memory_space<vmem>>, %arg2: memref<1x256xf32, #tpu.memory_space<vmem>>, %arg3: memref<64x256xf32, #tpu.memory_space<vmem>>, %arg4: memref<32x16xf32, #tpu.memory_space<vmem>>, %arg5: memref<1x16xf32, #tpu.memory_space<vmem>>, %arg6: memref<4x16xf32, #tpu.memory_space<vmem>>) attributes {dimension_semantics = [], scalar_prefetch = 0 : i64, scratch_operands = 0 : i64, tpu.core_type = #tpu.core_type<tc>} {
    %c0 = arith.constant 0 : index
    %c0_0 = arith.constant 0 : index
    %0 = vector.load %arg3[%c0, %c0_0] : memref<64x256xf32, #tpu.memory_space<vmem>>, vector<64x256xf32>
    %c0_1 = arith.constant 0 : index
    %c0_2 = arith.constant 0 : index
    %1 = vector.load %arg1[%c0_1, %c0_2] : memref<1x256xf32, #tpu.memory_space<vmem>>, vector<1x256xf32>
    %c0_3 = arith.constant 0 : index
    %c0_4 = arith.constant 0 : index
    %2 = vector.load %arg2[%c0_3, %c0_4] : memref<1x256xf32, #tpu.memory_space<vmem>>, vector<1x256xf32>
    %c0_5 = arith.constant 0 : index
    %c0_6 = arith.constant 0 : index
    %3 = vector.load %arg0[%c0_5, %c0_6] : memref<4x8xf32, #tpu.memory_space<vmem>>, vector<4x8xf32>
    %4 = tpu.iota {dimensions = array<i32: 1>} : vector<1x64xi32>
    %c32_i32 = arith.constant 32 : i32
    %5 = vector.broadcast %c32_i32 : i32 to vector<1x64xi32>
    %6 = arith.cmpi slt, %4, %5 : vector<1x64xi32>
    %7 = arith.extui %6 : vector<1x64xi1> to vector<1x64xi32>
    %8 = arith.sitofp %7 : vector<1x64xi32> to vector<1x64xf32>
    %9 = vector.extract_strided_slice %3 {offsets = [0, 0], sizes = [4, 1], strides = [1, 1]} : vector<4x8xf32> to vector<4x1xf32>
    %10 = vector.broadcast %9 : vector<4x1xf32> to vector<4x256xf32>
    %11 = vector.broadcast %1 : vector<1x256xf32> to vector<4x256xf32>
    %12 = arith.mulf %10, %11 : vector<4x256xf32>
    %13 = vector.broadcast %2 : vector<1x256xf32> to vector<4x256xf32>
    %14 = arith.addf %12, %13 : vector<4x256xf32>
    %cst = arith.constant 0.000000e+00 : f32
    %15 = vector.broadcast %cst : f32 to vector<4x64xf32>
    %16 = arith.negf %14 : vector<4x256xf32>
    %17 = math.exp %16 : vector<4x256xf32>
    %cst_7 = arith.constant 1.000000e+00 : f32
    %18 = vector.broadcast %cst_7 : f32 to vector<4x256xf32>
    %19 = arith.addf %18, %17 : vector<4x256xf32>
    %20 = arith.divf %18, %19 : vector<4x256xf32>
    %21 = vector.extract_strided_slice %20 {offsets = [0, 0], sizes = [4, 64], strides = [1, 1]} : vector<4x256xf32> to vector<4x64xf32>
    %22 = vector.extract_strided_slice %20 {offsets = [0, 64], sizes = [4, 64], strides = [1, 1]} : vector<4x256xf32> to vector<4x64xf32>
    %23 = vector.extract_strided_slice %20 {offsets = [0, 128], sizes = [4, 64], strides = [1, 1]} : vector<4x256xf32> to vector<4x64xf32>
    %cst_8 = arith.constant 2.000000e+00 : f32
    %24 = vector.broadcast %cst_8 : f32 to vector<4x64xf32>
    %25 = arith.mulf %24, %23 : vector<4x64xf32>
    %cst_9 = arith.constant 1.000000e+00 : f32
    %26 = vector.broadcast %cst_9 : f32 to vector<4x64xf32>
    %27 = arith.subf %25, %26 : vector<4x64xf32>
    %28 = vector.extract_strided_slice %20 {offsets = [0, 192], sizes = [4, 64], strides = [1, 1]} : vector<4x256xf32> to vector<4x64xf32>
    %29 = arith.mulf %22, %15 : vector<4x64xf32>
    %30 = arith.mulf %21, %27 : vector<4x64xf32>
    %31 = arith.addf %29, %30 : vector<4x64xf32>
    %32 = math.tanh %31 : vector<4x64xf32>
    %33 = arith.mulf %28, %32 : vector<4x64xf32>
    %34 = vector.broadcast %8 : vector<1x64xf32> to vector<4x64xf32>
    %35 = arith.mulf %33, %34 : vector<4x64xf32>
    %36 = vector.broadcast %8 : vector<1x64xf32> to vector<4x64xf32>
    %37 = arith.mulf %31, %36 : vector<4x64xf32>
    %38 = vector.extract_strided_slice %3 {offsets = [0, 1], sizes = [4, 1], strides = [1, 1]} : vector<4x8xf32> to vector<4x1xf32>
    %39 = vector.broadcast %38 : vector<4x1xf32> to vector<4x256xf32>
    %40 = vector.broadcast %1 : vector<1x256xf32> to vector<4x256xf32>
    %41 = arith.mulf %39, %40 : vector<4x256xf32>
    %42 = vector.broadcast %2 : vector<1x256xf32> to vector<4x256xf32>
    %43 = arith.addf %41, %42 : vector<4x256xf32>
    %cst_10 = arith.constant dense<0.000000e+00> : vector<4x256xf32>
    %44 = tpu.matmul %35, %0, %cst_10 {dimension_numbers = #tpu.dot_dimension_numbers<[1], [0], [0], [1], [0, 0, 1, 1], [], []>} : vector<4x64xf32>, vector<64x256xf32>, vector<4x256xf32> -> vector<4x256xf32>
    %45 = arith.addf %43, %44 : vector<4x256xf32>
    %46 = arith.negf %45 : vector<4x256xf32>
    %47 = math.exp %46 : vector<4x256xf32>
    %cst_11 = arith.constant 1.000000e+00 : f32
    %48 = vector.broadcast %cst_11 : f32 to vector<4x256xf32>
    %49 = arith.addf %48, %47 : vector<4x256xf32>
    %50 = arith.divf %48, %49 : vector<4x256xf32>
    %51 = vector.extract_strided_slice %50 {offsets = [0, 0], sizes = [4, 64], strides = [1, 1]} : vector<4x256xf32> to vector<4x64xf32>
    %52 = vector.extract_strided_slice %50 {offsets = [0, 64], sizes = [4, 64], strides = [1, 1]} : vector<4x256xf32> to vector<4x64xf32>
    %53 = vector.extract_strided_slice %50 {offsets = [0, 128], sizes = [4, 64], strides = [1, 1]} : vector<4x256xf32> to vector<4x64xf32>
    %cst_12 = arith.constant 2.000000e+00 : f32
    %54 = vector.broadcast %cst_12 : f32 to vector<4x64xf32>
    %55 = arith.mulf %54, %53 : vector<4x64xf32>
    %cst_13 = arith.constant 1.000000e+00 : f32
    %56 = vector.broadcast %cst_13 : f32 to vector<4x64xf32>
    %57 = arith.subf %55, %56 : vector<4x64xf32>
    %58 = vector.extract_strided_slice %50 {offsets = [0, 192], sizes = [4, 64], strides = [1, 1]} : vector<4x256xf32> to vector<4x64xf32>
    %59 = arith.mulf %52, %37 : vector<4x64xf32>
    %60 = arith.mulf %51, %57 : vector<4x64xf32>
    %61 = arith.addf %59, %60 : vector<4x64xf32>
    %62 = math.tanh %61 : vector<4x64xf32>
    %63 = arith.mulf %58, %62 : vector<4x64xf32>
    %64 = vector.extract_strided_slice %3 {offsets = [0, 2], sizes = [4, 1], strides = [1, 1]} : vector<4x8xf32> to vector<4x1xf32>
    %65 = vector.broadcast %64 : vector<4x1xf32> to vector<4x256xf32>
    %66 = vector.broadcast %1 : vector<1x256xf32> to vector<4x256xf32>
    %67 = arith.mulf %65, %66 : vector<4x256xf32>
    %68 = vector.broadcast %2 : vector<1x256xf32> to vector<4x256xf32>
    %69 = arith.addf %67, %68 : vector<4x256xf32>
    %cst_14 = arith.constant dense<0.000000e+00> : vector<4x256xf32>
    %70 = tpu.matmul %63, %0, %cst_14 {dimension_numbers = #tpu.dot_dimension_numbers<[1], [0], [0], [1], [0, 0, 1, 1], [], []>} : vector<4x64xf32>, vector<64x256xf32>, vector<4x256xf32> -> vector<4x256xf32>
    %71 = arith.addf %69, %70 : vector<4x256xf32>
    %72 = arith.negf %71 : vector<4x256xf32>
    %73 = math.exp %72 : vector<4x256xf32>
    %cst_15 = arith.constant 1.000000e+00 : f32
    %74 = vector.broadcast %cst_15 : f32 to vector<4x256xf32>
    %75 = arith.addf %74, %73 : vector<4x256xf32>
    %76 = arith.divf %74, %75 : vector<4x256xf32>
    %77 = vector.extract_strided_slice %76 {offsets = [0, 0], sizes = [4, 64], strides = [1, 1]} : vector<4x256xf32> to vector<4x64xf32>
    %78 = vector.extract_strided_slice %76 {offsets = [0, 64], sizes = [4, 64], strides = [1, 1]} : vector<4x256xf32> to vector<4x64xf32>
    %79 = vector.extract_strided_slice %76 {offsets = [0, 128], sizes = [4, 64], strides = [1, 1]} : vector<4x256xf32> to vector<4x64xf32>
    %cst_16 = arith.constant 2.000000e+00 : f32
    %80 = vector.broadcast %cst_16 : f32 to vector<4x64xf32>
    %81 = arith.mulf %80, %79 : vector<4x64xf32>
    %cst_17 = arith.constant 1.000000e+00 : f32
    %82 = vector.broadcast %cst_17 : f32 to vector<4x64xf32>
    %83 = arith.subf %81, %82 : vector<4x64xf32>
    %84 = vector.extract_strided_slice %76 {offsets = [0, 192], sizes = [4, 64], strides = [1, 1]} : vector<4x256xf32> to vector<4x64xf32>
    %85 = arith.mulf %78, %61 : vector<4x64xf32>
    %86 = arith.mulf %77, %83 : vector<4x64xf32>
    %87 = arith.addf %85, %86 : vector<4x64xf32>
    %88 = math.tanh %87 : vector<4x64xf32>
    %89 = arith.mulf %84, %88 : vector<4x64xf32>
    %90 = vector.extract_strided_slice %3 {offsets = [0, 3], sizes = [4, 1], strides = [1, 1]} : vector<4x8xf32> to vector<4x1xf32>
    %91 = vector.broadcast %90 : vector<4x1xf32> to vector<4x256xf32>
    %92 = vector.broadcast %1 : vector<1x256xf32> to vector<4x256xf32>
    %93 = arith.mulf %91, %92 : vector<4x256xf32>
    %94 = vector.broadcast %2 : vector<1x256xf32> to vector<4x256xf32>
    %95 = arith.addf %93, %94 : vector<4x256xf32>
    %cst_18 = arith.constant dense<0.000000e+00> : vector<4x256xf32>
    %96 = tpu.matmul %89, %0, %cst_18 {dimension_numbers = #tpu.dot_dimension_numbers<[1], [0], [0], [1], [0, 0, 1, 1], [], []>} : vector<4x64xf32>, vector<64x256xf32>, vector<4x256xf32> -> vector<4x256xf32>
    %97 = arith.addf %95, %96 : vector<4x256xf32>
    %98 = arith.negf %97 : vector<4x256xf32>
    %99 = math.exp %98 : vector<4x256xf32>
    %cst_19 = arith.constant 1.000000e+00 : f32
    %100 = vector.broadcast %cst_19 : f32 to vector<4x256xf32>
    %101 = arith.addf %100, %99 : vector<4x256xf32>
    %102 = arith.divf %100, %101 : vector<4x256xf32>
    %103 = vector.extract_strided_slice %102 {offsets = [0, 0], sizes = [4, 64], strides = [1, 1]} : vector<4x256xf32> to vector<4x64xf32>
    %104 = vector.extract_strided_slice %102 {offsets = [0, 64], sizes = [4, 64], strides = [1, 1]} : vector<4x256xf32> to vector<4x64xf32>
    %105 = vector.extract_strided_slice %102 {offsets = [0, 128], sizes = [4, 64], strides = [1, 1]} : vector<4x256xf32> to vector<4x64xf32>
    %cst_20 = arith.constant 2.000000e+00 : f32
    %106 = vector.broadcast %cst_20 : f32 to vector<4x64xf32>
    %107 = arith.mulf %106, %105 : vector<4x64xf32>
    %cst_21 = arith.constant 1.000000e+00 : f32
    %108 = vector.broadcast %cst_21 : f32 to vector<4x64xf32>
    %109 = arith.subf %107, %108 : vector<4x64xf32>
    %110 = vector.extract_strided_slice %102 {offsets = [0, 192], sizes = [4, 64], strides = [1, 1]} : vector<4x256xf32> to vector<4x64xf32>
    %111 = arith.mulf %104, %87 : vector<4x64xf32>
    %112 = arith.mulf %103, %109 : vector<4x64xf32>
    %113 = arith.addf %111, %112 : vector<4x64xf32>
    %114 = math.tanh %113 : vector<4x64xf32>
    %115 = arith.mulf %110, %114 : vector<4x64xf32>
    %116 = vector.extract_strided_slice %3 {offsets = [0, 4], sizes = [4, 1], strides = [1, 1]} : vector<4x8xf32> to vector<4x1xf32>
    %117 = vector.broadcast %116 : vector<4x1xf32> to vector<4x256xf32>
    %118 = vector.broadcast %1 : vector<1x256xf32> to vector<4x256xf32>
    %119 = arith.mulf %117, %118 : vector<4x256xf32>
    %120 = vector.broadcast %2 : vector<1x256xf32> to vector<4x256xf32>
    %121 = arith.addf %119, %120 : vector<4x256xf32>
    %cst_22 = arith.constant dense<0.000000e+00> : vector<4x256xf32>
    %122 = tpu.matmul %115, %0, %cst_22 {dimension_numbers = #tpu.dot_dimension_numbers<[1], [0], [0], [1], [0, 0, 1, 1], [], []>} : vector<4x64xf32>, vector<64x256xf32>, vector<4x256xf32> -> vector<4x256xf32>
    %123 = arith.addf %121, %122 : vector<4x256xf32>
    %124 = arith.negf %123 : vector<4x256xf32>
    %125 = math.exp %124 : vector<4x256xf32>
    %cst_23 = arith.constant 1.000000e+00 : f32
    %126 = vector.broadcast %cst_23 : f32 to vector<4x256xf32>
    %127 = arith.addf %126, %125 : vector<4x256xf32>
    %128 = arith.divf %126, %127 : vector<4x256xf32>
    %129 = vector.extract_strided_slice %128 {offsets = [0, 0], sizes = [4, 64], strides = [1, 1]} : vector<4x256xf32> to vector<4x64xf32>
    %130 = vector.extract_strided_slice %128 {offsets = [0, 64], sizes = [4, 64], strides = [1, 1]} : vector<4x256xf32> to vector<4x64xf32>
    %131 = vector.extract_strided_slice %128 {offsets = [0, 128], sizes = [4, 64], strides = [1, 1]} : vector<4x256xf32> to vector<4x64xf32>
    %cst_24 = arith.constant 2.000000e+00 : f32
    %132 = vector.broadcast %cst_24 : f32 to vector<4x64xf32>
    %133 = arith.mulf %132, %131 : vector<4x64xf32>
    %cst_25 = arith.constant 1.000000e+00 : f32
    %134 = vector.broadcast %cst_25 : f32 to vector<4x64xf32>
    %135 = arith.subf %133, %134 : vector<4x64xf32>
    %136 = vector.extract_strided_slice %128 {offsets = [0, 192], sizes = [4, 64], strides = [1, 1]} : vector<4x256xf32> to vector<4x64xf32>
    %137 = arith.mulf %130, %113 : vector<4x64xf32>
    %138 = arith.mulf %129, %135 : vector<4x64xf32>
    %139 = arith.addf %137, %138 : vector<4x64xf32>
    %140 = math.tanh %139 : vector<4x64xf32>
    %141 = arith.mulf %136, %140 : vector<4x64xf32>
    %142 = vector.extract_strided_slice %3 {offsets = [0, 5], sizes = [4, 1], strides = [1, 1]} : vector<4x8xf32> to vector<4x1xf32>
    %143 = vector.broadcast %142 : vector<4x1xf32> to vector<4x256xf32>
    %144 = vector.broadcast %1 : vector<1x256xf32> to vector<4x256xf32>
    %145 = arith.mulf %143, %144 : vector<4x256xf32>
    %146 = vector.broadcast %2 : vector<1x256xf32> to vector<4x256xf32>
    %147 = arith.addf %145, %146 : vector<4x256xf32>
    %cst_26 = arith.constant dense<0.000000e+00> : vector<4x256xf32>
    %148 = tpu.matmul %141, %0, %cst_26 {dimension_numbers = #tpu.dot_dimension_numbers<[1], [0], [0], [1], [0, 0, 1, 1], [], []>} : vector<4x64xf32>, vector<64x256xf32>, vector<4x256xf32> -> vector<4x256xf32>
    %149 = arith.addf %147, %148 : vector<4x256xf32>
    %150 = arith.negf %149 : vector<4x256xf32>
    %151 = math.exp %150 : vector<4x256xf32>
    %cst_27 = arith.constant 1.000000e+00 : f32
    %152 = vector.broadcast %cst_27 : f32 to vector<4x256xf32>
    %153 = arith.addf %152, %151 : vector<4x256xf32>
    %154 = arith.divf %152, %153 : vector<4x256xf32>
    %155 = vector.extract_strided_slice %154 {offsets = [0, 0], sizes = [4, 64], strides = [1, 1]} : vector<4x256xf32> to vector<4x64xf32>
    %156 = vector.extract_strided_slice %154 {offsets = [0, 64], sizes = [4, 64], strides = [1, 1]} : vector<4x256xf32> to vector<4x64xf32>
    %157 = vector.extract_strided_slice %154 {offsets = [0, 128], sizes = [4, 64], strides = [1, 1]} : vector<4x256xf32> to vector<4x64xf32>
    %cst_28 = arith.constant 2.000000e+00 : f32
    %158 = vector.broadcast %cst_28 : f32 to vector<4x64xf32>
    %159 = arith.mulf %158, %157 : vector<4x64xf32>
    %cst_29 = arith.constant 1.000000e+00 : f32
    %160 = vector.broadcast %cst_29 : f32 to vector<4x64xf32>
    %161 = arith.subf %159, %160 : vector<4x64xf32>
    %162 = vector.extract_strided_slice %154 {offsets = [0, 192], sizes = [4, 64], strides = [1, 1]} : vector<4x256xf32> to vector<4x64xf32>
    %163 = arith.mulf %156, %139 : vector<4x64xf32>
    %164 = arith.mulf %155, %161 : vector<4x64xf32>
    %165 = arith.addf %163, %164 : vector<4x64xf32>
    %166 = math.tanh %165 : vector<4x64xf32>
    %167 = arith.mulf %162, %166 : vector<4x64xf32>
    %168 = vector.extract_strided_slice %3 {offsets = [0, 6], sizes = [4, 1], strides = [1, 1]} : vector<4x8xf32> to vector<4x1xf32>
    %169 = vector.broadcast %168 : vector<4x1xf32> to vector<4x256xf32>
    %170 = vector.broadcast %1 : vector<1x256xf32> to vector<4x256xf32>
    %171 = arith.mulf %169, %170 : vector<4x256xf32>
    %172 = vector.broadcast %2 : vector<1x256xf32> to vector<4x256xf32>
    %173 = arith.addf %171, %172 : vector<4x256xf32>
    %cst_30 = arith.constant dense<0.000000e+00> : vector<4x256xf32>
    %174 = tpu.matmul %167, %0, %cst_30 {dimension_numbers = #tpu.dot_dimension_numbers<[1], [0], [0], [1], [0, 0, 1, 1], [], []>} : vector<4x64xf32>, vector<64x256xf32>, vector<4x256xf32> -> vector<4x256xf32>
    %175 = arith.addf %173, %174 : vector<4x256xf32>
    %176 = arith.negf %175 : vector<4x256xf32>
    %177 = math.exp %176 : vector<4x256xf32>
    %cst_31 = arith.constant 1.000000e+00 : f32
    %178 = vector.broadcast %cst_31 : f32 to vector<4x256xf32>
    %179 = arith.addf %178, %177 : vector<4x256xf32>
    %180 = arith.divf %178, %179 : vector<4x256xf32>
    %181 = vector.extract_strided_slice %180 {offsets = [0, 0], sizes = [4, 64], strides = [1, 1]} : vector<4x256xf32> to vector<4x64xf32>
    %182 = vector.extract_strided_slice %180 {offsets = [0, 64], sizes = [4, 64], strides = [1, 1]} : vector<4x256xf32> to vector<4x64xf32>
    %183 = vector.extract_strided_slice %180 {offsets = [0, 128], sizes = [4, 64], strides = [1, 1]} : vector<4x256xf32> to vector<4x64xf32>
    %cst_32 = arith.constant 2.000000e+00 : f32
    %184 = vector.broadcast %cst_32 : f32 to vector<4x64xf32>
    %185 = arith.mulf %184, %183 : vector<4x64xf32>
    %cst_33 = arith.constant 1.000000e+00 : f32
    %186 = vector.broadcast %cst_33 : f32 to vector<4x64xf32>
    %187 = arith.subf %185, %186 : vector<4x64xf32>
    %188 = vector.extract_strided_slice %180 {offsets = [0, 192], sizes = [4, 64], strides = [1, 1]} : vector<4x256xf32> to vector<4x64xf32>
    %189 = arith.mulf %182, %165 : vector<4x64xf32>
    %190 = arith.mulf %181, %187 : vector<4x64xf32>
    %191 = arith.addf %189, %190 : vector<4x64xf32>
    %192 = math.tanh %191 : vector<4x64xf32>
    %193 = arith.mulf %188, %192 : vector<4x64xf32>
    %194 = vector.extract_strided_slice %3 {offsets = [0, 7], sizes = [4, 1], strides = [1, 1]} : vector<4x8xf32> to vector<4x1xf32>
    %195 = vector.broadcast %194 : vector<4x1xf32> to vector<4x256xf32>
    %196 = vector.broadcast %1 : vector<1x256xf32> to vector<4x256xf32>
    %197 = arith.mulf %195, %196 : vector<4x256xf32>
    %198 = vector.broadcast %2 : vector<1x256xf32> to vector<4x256xf32>
    %199 = arith.addf %197, %198 : vector<4x256xf32>
    %cst_34 = arith.constant dense<0.000000e+00> : vector<4x256xf32>
    %200 = tpu.matmul %193, %0, %cst_34 {dimension_numbers = #tpu.dot_dimension_numbers<[1], [0], [0], [1], [0, 0, 1, 1], [], []>} : vector<4x64xf32>, vector<64x256xf32>, vector<4x256xf32> -> vector<4x256xf32>
    %201 = arith.addf %199, %200 : vector<4x256xf32>
    %202 = arith.negf %201 : vector<4x256xf32>
    %203 = math.exp %202 : vector<4x256xf32>
    %cst_35 = arith.constant 1.000000e+00 : f32
    %204 = vector.broadcast %cst_35 : f32 to vector<4x256xf32>
    %205 = arith.addf %204, %203 : vector<4x256xf32>
    %206 = arith.divf %204, %205 : vector<4x256xf32>
    %207 = vector.extract_strided_slice %206 {offsets = [0, 0], sizes = [4, 64], strides = [1, 1]} : vector<4x256xf32> to vector<4x64xf32>
    %208 = vector.extract_strided_slice %206 {offsets = [0, 64], sizes = [4, 64], strides = [1, 1]} : vector<4x256xf32> to vector<4x64xf32>
    %209 = vector.extract_strided_slice %206 {offsets = [0, 128], sizes = [4, 64], strides = [1, 1]} : vector<4x256xf32> to vector<4x64xf32>
    %cst_36 = arith.constant 2.000000e+00 : f32
    %210 = vector.broadcast %cst_36 : f32 to vector<4x64xf32>
    %211 = arith.mulf %210, %209 : vector<4x64xf32>
    %cst_37 = arith.constant 1.000000e+00 : f32
    %212 = vector.broadcast %cst_37 : f32 to vector<4x64xf32>
    %213 = arith.subf %211, %212 : vector<4x64xf32>
    %214 = vector.extract_strided_slice %206 {offsets = [0, 192], sizes = [4, 64], strides = [1, 1]} : vector<4x256xf32> to vector<4x64xf32>
    %215 = arith.mulf %208, %191 : vector<4x64xf32>
    %216 = arith.mulf %207, %213 : vector<4x64xf32>
    %217 = arith.addf %215, %216 : vector<4x64xf32>
    %218 = math.tanh %217 : vector<4x64xf32>
    %219 = arith.mulf %214, %218 : vector<4x64xf32>
    %cst_38 = arith.constant dense<0.000000e+00> : vector<4x256xf32>
    %220 = tpu.matmul %219, %0, %cst_38 {dimension_numbers = #tpu.dot_dimension_numbers<[1], [0], [0], [1], [0, 0, 1, 1], [], []>} : vector<4x64xf32>, vector<64x256xf32>, vector<4x256xf32> -> vector<4x256xf32>
    %221 = vector.broadcast %2 : vector<1x256xf32> to vector<4x256xf32>
    %222 = arith.addf %221, %220 : vector<4x256xf32>
    %223 = arith.negf %222 : vector<4x256xf32>
    %224 = math.exp %223 : vector<4x256xf32>
    %cst_39 = arith.constant 1.000000e+00 : f32
    %225 = vector.broadcast %cst_39 : f32 to vector<4x256xf32>
    %226 = arith.addf %225, %224 : vector<4x256xf32>
    %227 = arith.divf %225, %226 : vector<4x256xf32>
    %228 = vector.extract_strided_slice %227 {offsets = [0, 0], sizes = [4, 64], strides = [1, 1]} : vector<4x256xf32> to vector<4x64xf32>
    %229 = vector.extract_strided_slice %227 {offsets = [0, 64], sizes = [4, 64], strides = [1, 1]} : vector<4x256xf32> to vector<4x64xf32>
    %230 = vector.extract_strided_slice %227 {offsets = [0, 128], sizes = [4, 64], strides = [1, 1]} : vector<4x256xf32> to vector<4x64xf32>
    %cst_40 = arith.constant 2.000000e+00 : f32
    %231 = vector.broadcast %cst_40 : f32 to vector<4x64xf32>
    %232 = arith.mulf %231, %230 : vector<4x64xf32>
    %cst_41 = arith.constant 1.000000e+00 : f32
    %233 = vector.broadcast %cst_41 : f32 to vector<4x64xf32>
    %234 = arith.subf %232, %233 : vector<4x64xf32>
    %235 = vector.extract_strided_slice %227 {offsets = [0, 192], sizes = [4, 64], strides = [1, 1]} : vector<4x256xf32> to vector<4x64xf32>
    %236 = arith.mulf %229, %217 : vector<4x64xf32>
    %237 = arith.mulf %228, %234 : vector<4x64xf32>
    %238 = arith.addf %236, %237 : vector<4x64xf32>
    %239 = math.tanh %238 : vector<4x64xf32>
    %240 = arith.mulf %235, %239 : vector<4x64xf32>
    %241 = vector.extract_strided_slice %240 {offsets = [0, 32], sizes = [4, 32], strides = [1, 1]} : vector<4x64xf32> to vector<4x32xf32>
    %c0_42 = arith.constant 0 : index
    %c0_43 = arith.constant 0 : index
    %242 = vector.load %arg4[%c0_42, %c0_43] : memref<32x16xf32, #tpu.memory_space<vmem>>, vector<32x16xf32>
    %cst_44 = arith.constant dense<0.000000e+00> : vector<4x16xf32>
    %243 = tpu.matmul %241, %242, %cst_44 {dimension_numbers = #tpu.dot_dimension_numbers<[1], [0], [0], [1], [0, 0, 1, 1], [], []>} : vector<4x32xf32>, vector<32x16xf32>, vector<4x16xf32> -> vector<4x16xf32>
    %c0_45 = arith.constant 0 : index
    %c0_46 = arith.constant 0 : index
    %244 = vector.load %arg5[%c0_45, %c0_46] : memref<1x16xf32, #tpu.memory_space<vmem>>, vector<1x16xf32>
    %245 = vector.broadcast %244 : vector<1x16xf32> to vector<4x16xf32>
    %246 = arith.addf %243, %245 : vector<4x16xf32>
    %c0_47 = arith.constant 0 : index
    %c0_48 = arith.constant 0 : index
    %247 = vector.load %arg6[%c0_47, %c0_48] : memref<4x16xf32, #tpu.memory_space<vmem>>, vector<4x16xf32>
    tpu.vector_store %arg6[%c0_47, %c0_48], %246 {strides = array<i32>} : memref<4x16xf32, #tpu.memory_space<vmem>>, vector<4x16xf32>,
    return
  }
}

</mosaic_0001>

<bundles_post_ra>
// kernel: tpu_custom_call.1
= control target key start
LH: loop header
LB: loop body
LE: loop exit
PB: predicated region body
PF: predicated region fallthrough
CT: control target
= control target key end

     0   :  { %11 = vsyncpa [#allocation3], 0  ;;  %s1710_s0 = inlined_call_operand.vmem [shape: f32[4,8], index: 0, kind: input, shape index: {}]   ;;  %s1711_s1 = inlined_call_operand.vmem [shape: f32[1,256], index: 1, kind: input, shape index: {}]   ;;  %s1712_s2 = inlined_call_operand.vmem [shape: f32[1,256], index: 2, kind: input, shape index: {}]   ;;  %s1713_s3 = inlined_call_operand.hbm [shape: f32[64,256], index: 3, kind: input, shape index: {}]   ;;  %s1714_s4 = inlined_call_operand.vmem [shape: f32[32,16], index: 4, kind: input, shape index: {}]   ;;  %s1715_s5 = inlined_call_operand.vmem [shape: f32[1,16], index: 5, kind: input, shape index: {}]   ;;  %s1716_s6 = inlined_call_operand.hbm [shape: f32[4,16], index: 6, kind: output, shape index: {}]  }
   0x1   :  { %12 = vsyncpa [#allocation4], 0  ;;  %s1442_s21 = smov [#allocation2]   ;;  %s1394_s25 = scalar_lea.hbm %s1713_s3, 2048 }
   0x2   :  { %s24_s22 = sshll.u32 %s1442_s21, 4  ;;  %p1395_p0 = scmp.ne.s32.totalorder %s1713_s3, %s1394_s25  ;;  %s25_s22 = int_to_ptr.vmem [resolvable:$true] %s24_s22 }
   0x3   :  { %p1398_p1 = scmp.lt.u32.totalorder %s1394_s25, %s1713_s3 }
   0x5   :  { %p1400_p2 = pnand %p1398_p1, %p1395_p0 }
   0x7   :  { %1403 = shalt.err (!%p1400_p2)
}
   0x8   :  { %s1404_s30 = scalar_lea.vmem %s25_s22, 2048  ;;  %p1409_p4 = scmp.lt.s32.totalorder %s25_s22, %s25_s22 }
   0x9   :  { %p1405_p3 = scmp.ne.s32.totalorder %s25_s22, %s1404_s30  ;;  %p1410_p5 = scmp.lt.s32.totalorder %s1404_s30, %s1404_s30 }
   0xb   :  { %p1411_p6 = por %p1410_p5, %p1409_p4 }
   0xd   :  { %p1412_p7 = pnand %p1411_p6, %p1405_p3 }
   0xf   :  { %1415 = shalt.err (!%p1412_p7)
}
  0x10   :  { %s1443_s7 = smov 256   ;;  %s1444_s8 = smov 16  }
  0x11   :  { %30 = dma.hbm_to_vmem [thread:$0]  %s1713_s3, 2048, %s25_s22, [#allocation3], %s1443_s7, %s1443_s7, %s1444_s8  }
  0x12   :  { %1438 = dma.done.wait [#allocation3], 2048  }
  0x13   :  { %1439 = vsyncadd [#allocation3], 4294965248  ;;  %v1445_v0 = vmov 0   ;;  %v1509_v1 = vld [vmem:[%s1710_s0] sm:$0xf]  ;;  %v57_v2 = vlaneseq  ;;  %v1446_v4 = vmov 0.0  }
  0x14   :  { %1296 = vset.pattern.permute.xlu0 %v1445_v0  ;;  %200 = vmatprep.mubr.f32.mxu0 %v1446_v4  ;;  %s1447_s3 = smov 64   ;;  %v54_v9 = vld [vmem:[%s1711_s1] sm:$0x3]  ;;  %v39_v31 = vld [vmem:[#allocation2 + $0x8] sm:$0xff]  ;;  %v41_v32 = vld [vmem:[#allocation2 + $0x18] sm:$0xff]  ;;  %v1448_v58 = vmov 1  }
  0x15   :  { %64 = vperm.xlu0 %1296, %v1509_v1   ;;  %v58_v3 = vand.u32 127, %v57_v2  ;;  %309 = vmatprep.mubr.f32.mxu1 %v1446_v4  ;;  %v69_v6 = vshrl.u32 %v57_v2, 7  ;;  %v55_v10 = vld [vmem:[%s1712_s2] sm:$0x3]  ;;  %v1535_v34 = vpack.c.bf16 %v41_v32, %v39_v31  ;;  %v40_v35 = vld [vmem:[#allocation2 + $0x10] sm:$0xff]  ;;  %v43_v36 = vld [vmem:[#allocation2 + $0x28] sm:$0xff] }
  0x16   :  { %v38_v33 = vld [vmem:[#allocation2] sm:$0xff]  ;;  %v45_v37 = vld [vmem:[#allocation2 + $0x38] sm:$0xff]  ;;  %v44_v41 = vld [vmem:[#allocation2 + $0x30] sm:$0xff]  ;;  %vm133_vm1 = vcmask 523264   ;;  %vm1456_vm2 = vmmov 0   ;;  %s1457_s22 = smov 32  }
  0x17   :  { %vm59_vm0 = vcmp.lt.s32.totalorder %v58_v3, 32  ;;  %v70_v7 = vsub.s32 0, %v69_v6  ;;  %v74_v8 = vsub.s32 1, %v69_v6  ;;  %v1537_v38 = vpack.c.bf16 %v40_v35, %v38_v33  ;;  %v42_v40 = vld [vmem:[#allocation2 + $0x20] sm:$0xff]  ;;  %v47_v42 = vld [vmem:[#allocation2 + $0x48] sm:$0xff]  ;;  %1146 = vmatprep.subr.bf16.mxu0 %v1535_v34  ;;  %v49_v43 = vld [vmem:[#allocation2 + $0x58] sm:$0xff]  ;;  %1162 = vmatprep.subr.bf16.mxu1 %v1535_v34 }
  0x18   :  { %v1091_v5 = vsel %vm59_vm0, 1.0, %v1446_v4  ;;  %v1539_v39 = vpack.c.bf16 %v45_v37, %v43_v36  ;;  %v1544_v44 = vpack.c.bf16 %v44_v41, %v42_v40  ;;  %v1548_v45 = vpack.c.bf16 %v49_v43, %v47_v42  ;;  %v46_v46 = vld [vmem:[#allocation2 + $0x40] sm:$0xff]  ;;  %v48_v47 = vld [vmem:[#allocation2 + $0x50] sm:$0xff]  ;;  %v51_v48 = vld [vmem:[#allocation2 + $0x68] sm:$0xff]  ;;  %s1458_s24 = smov [#allocation5]  }
  0x19   :  { %117 = vrot.lane.b32.xlu1 %v1091_v5, %s1447_s3  ;;  %v1522_v11 = vrot.slane %v54_v9, %v70_v7  ;;  %v1524_v12 = vrot.slane %v54_v9, %v74_v8  ;;  %v1526_v13 = vrot.slane %v55_v10, %v70_v7  ;;  %v1528_v14 = vrot.slane %v55_v10, %v74_v8  ;;  %v53_v49 = vld [vmem:[#allocation2 + $0x78] sm:$0xff]  ;;  %v50_v52 = vld [vmem:[#allocation2 + $0x60] sm:$0xff]  ;;  %v52_v53 = vld [vmem:[#allocation2 + $0x70] sm:$0xff]  ;;  %s1082_s25 = sshll.u32 %s1458_s24, 4  ;;  %s1083_s25 = int_to_ptr.vmem [resolvable:$true] %s1082_s25 }
  0x1a   :  { %1148 = vmatpush1.bf16.msra.mxu0 %v1537_v38  ;;  %1164 = vmatpush1.bf16.msra.mxu1 %v1537_v38  ;;  %v1552_v50 = vpack.c.bf16 %v48_v47, %v46_v46  ;;  %v1556_v51 = vpack.c.bf16 %v53_v49, %v51_v48  ;;  %v1560_v54 = vpack.c.bf16 %v52_v53, %v50_v52  ;;  %vm1001_vm3 = vcmask 261120   ;;  %s1416_s26 = scalar_lea.vmem %s1083_s25, 64  ;;  %p1421_p9 = scmp.lt.s32.totalorder %s1083_s25, %s1083_s25 }
  0x1b   :  { %1150 = vmatprep.subr.bf16.mxu0 %v1539_v39  ;;  %1166 = vmatprep.subr.bf16.mxu1 %v1539_v39  ;;  %vm1074_vm4 = vcmask 125952   ;;  %p1417_p8 = scmp.ne.s32.totalorder %s1083_s25, %s1416_s26  ;;  %p1422_p10 = scmp.lt.s32.totalorder %s1416_s26, %s1416_s26 }
  0x1c   :  { %1297 = vset.pattern.permute.xlu0 %v1448_v58 }
  0x1d   :  { %p1423_p11 = por %p1422_p10, %p1421_p9 }
  0x1e   :  { %1152 = vmatpush1.bf16.msra.mxu0 %v1544_v44  ;;  %1168 = vmatpush1.bf16.msra.mxu1 %v1544_v44 }
  0x1f   :  { %1154 = vmatprep.subr.bf16.mxu0 %v1548_v45  ;;  %1170 = vmatprep.subr.bf16.mxu1 %v1548_v45  ;;  %p1424_p12 = pnand %p1423_p11, %p1417_p8 }
  0x22   :  { %1156 = vmatpush1.bf16.msra.mxu0 %v1552_v50  ;;  %1172 = vmatpush1.bf16.msra.mxu1 %v1552_v50 }
  0x23   :  { %1158 = vmatprep.subr.bf16.mxu0 %v1556_v51  ;;  %1174 = vmatprep.subr.bf16.mxu1 %v1556_v51 }
  0x26   :  { %1160 = vmatpush1.bf16.msra.mxu0 %v1560_v54  ;;  %1176 = vmatpush1.bf16.msra.mxu1 %v1560_v54 }
  0x27   :  { %1178 = vmatprep.subr.bf16.mxu0 %v1535_v34  ;;  %1194 = vmatprep.subr.bf16.mxu1 %v1535_v34 }
  0x8b   :  { %v118_v61 = vpop.permute.xlu1 %117 }
  0x94   :  { %v65_v15 = vpop.permute.xlu0 %64 }
  0x95   :  { %v78_v16 = vmul.f32 %v1522_v11, %v65_v15  ;;  %v79_v17 = vmul.f32 %v1524_v12, %v65_v15 }
  0x97   :  { %v91_v18 = vadd.f32 %v1526_v13, %v78_v16  ;;  %v92_v19 = vadd.f32 %v1528_v14, %v79_v17 }
  0x99   :  { %v1092_v20 = vmul.f32 -1.442695, %v91_v18  ;;  %v1093_v21 = vmul.f32 -1.442695, %v92_v19 }
  0x9b   :  { %1304 = vpow2.f32 %v1092_v20 }
  0x9c   :  { %1306 = vpow2.f32 %v1093_v21 }
  0xa5   :  { %v1305_v22 = vpop.eup %1304 }
  0xa6   :  { %v1307_v23 = vpop.eup %1306  ;;  %v99_v25 = vadd.f32 1.0, %v1305_v22 }
  0xa7   :  { %v100_v24 = vadd.f32 1.0, %v1307_v23 }
  0xa9   :  { %1308 = vrcp.f32 %v100_v24 }
  0xaa   :  { %1310 = vrcp.f32 %v99_v25 }
  0xb3   :  { %v1309_v26 = vpop.eup %1308 }
  0xb4   :  { %v105_v27 = vmul.f32 2.0, %v1309_v26  ;;  %v1311_v29 = vpop.eup %1310 }
  0xb5   :  { %v107_v55 = vmul.f32 0.0, %v1311_v29 }
  0xb6   :  { %v1094_v28 = vadd.f32 -1.0, %v105_v27 }
  0xb8   :  { %v108_v30 = vmul.f32 %v1311_v29, %v1094_v28 }
  0xba   :  { %110 = vrot.lane.b32.xlu0 %v108_v30, %s1447_s3  ;;  %v1449_v30 = vmov 2  }
  0xbe   :  { %123 = vperm.xlu0 %1297, %v1509_v1  }
  0xc2   :  { %1298 = vset.pattern.permute.xlu0 %v1449_v30 }
  0xc3   :  { %233 = vperm.xlu0 %1298, %v1509_v1  }
 0x12c   :  { %v111_v56 = vpop.permute.xlu0 %110 }
 0x12d   :  { %v113_v57 = vadd.f32 %v111_v56, %v107_v55 }
 0x12f   :  { %1312 = vtanh.f32 %v113_v57  ;;  %v121_v21 = vmul.f32 %v118_v61, %v113_v57 }
 0x139   :  { %v1313_v59 = vpop.eup %1312 }
 0x13a   :  { %v115_v60 = vmul.f32 %v1313_v59, %v1309_v26 }
 0x13c   :  { %v120_v62 = vmul.f32 %v118_v61, %v115_v60 }
 0x13d   :  { %v124_v0 = vpop.permute.xlu0 %123 }
 0x13e   :  { %131 = vrot.lane.b32.xlu1 %v120_v62, %s1447_s3  ;;  %v126_v2 = vmul.f32 %v124_v0, %v1522_v11  ;;  %v127_v3 = vmul.f32 %v124_v0, %v1524_v12 }
 0x140   :  { %v128_v5 = vadd.f32 %v126_v2, %v1526_v13  ;;  %v129_v6 = vadd.f32 %v127_v3, %v1528_v14  ;;  %v1450_v2 = vmov 3  }
 0x141   :  { %1299 = vset.pattern.permute.xlu0 %v1450_v2 }
 0x142   :  { %v234_v35 = vpop.permute.xlu0 %233  ;;  %342 = vperm.xlu0 %1299, %v1509_v1  }
 0x143   :  { %v236_v36 = vmul.f32 %v234_v35, %v1522_v11  ;;  %v237_v37 = vmul.f32 %v234_v35, %v1524_v12  ;;  %v1451_v35 = vmov 4  }
 0x145   :  { %v238_v40 = vadd.f32 %v236_v36, %v1526_v13  ;;  %v239_v41 = vadd.f32 %v237_v37, %v1528_v14 }
 0x146   :  { %1300 = vset.pattern.permute.xlu0 %v1451_v35 }
 0x147   :  { %451 = vperm.xlu0 %1300, %v1509_v1  }
 0x1b0   :  { %v132_v63 = vpop.permute.xlu1 %131 }
 0x1b1   :  { %1095 = vmatmul.mubr.msk.f32.vlgmr.msra.gmra.mrb[0].mxu0 %vm133_vm1, %v132_v63 }
 0x1b2   :  { %1180 = vmatpush1.bf16.msra.mxu0 %v1537_v38  ;;  %418 = vmatprep.mubr.f32.mxu0 %v1446_v4 }
 0x1b3   :  { %1182 = vmatprep.subr.bf16.mxu0 %v1539_v39 }
 0x1b6   :  { %1184 = vmatpush1.bf16.msra.mxu0 %v1544_v44 }
 0x1b7   :  { %1186 = vmatprep.subr.bf16.mxu0 %v1548_v45 }
 0x1ba   :  { %1188 = vmatpush1.bf16.msra.mxu0 %v1552_v50 }
 0x1bb   :  { %1190 = vmatprep.subr.bf16.mxu0 %v1556_v51 }
 0x1be   :  { %1192 = vmatpush1.bf16.msra.mxu0 %v1560_v54 }
 0x1bf   :  { %1210 = vmatprep.subr.bf16.mxu0 %v1535_v34 }
 0x284   :  { %v202_v7 = vpop.f32.mrb[0].mxu0 }
 0x285   :  { %v207_v8 = vadd.f32 %v202_v7, %v128_v5  ;;  %v204_v9 = vpop.f32.mrb[1].mxu0  ;;  %v343_v7 = vpop.permute.xlu0 %342 }
 0x286   :  { %v208_v10 = vadd.f32 %v204_v9, %v129_v6  ;;  %v346_v9 = vmul.f32 %v343_v7, %v1524_v12 }
 0x287   :  { %v1096_v15 = vmul.f32 -1.442695, %v207_v8  ;;  %v345_v8 = vmul.f32 %v343_v7, %v1522_v11 }
 0x288   :  { %v1097_v16 = vmul.f32 -1.442695, %v208_v10 }
 0x289   :  { %1314 = vpow2.f32 %v1096_v15  ;;  %v347_v10 = vadd.f32 %v345_v8, %v1526_v13  ;;  %v348_v15 = vadd.f32 %v346_v9, %v1528_v14 }
 0x28a   :  { %1316 = vpow2.f32 %v1097_v16 }
 0x293   :  { %v1315_v17 = vpop.eup %1314 }
 0x294   :  { %v1317_v18 = vpop.eup %1316  ;;  %v215_v19 = vadd.f32 1.0, %v1315_v17 }
 0x295   :  { %v216_v20 = vadd.f32 1.0, %v1317_v18 }
 0x296   :  { %1318 = vrcp.f32 %v215_v19 }
 0x297   :  { %1320 = vrcp.f32 %v216_v20 }
 0x2a0   :  { %v1319_v22 = vpop.eup %1318 }
 0x2a1   :  { %v1321_v23 = vpop.eup %1320  ;;  %v223_v24 = vmul.f32 %v1319_v22, %v121_v21 }
 0x2a2   :  { %v221_v25 = vmul.f32 2.0, %v1321_v23 }
 0x2a4   :  { %v1098_v26 = vadd.f32 -1.0, %v221_v25 }
 0x2a6   :  { %v224_v27 = vmul.f32 %v1319_v22, %v1098_v26 }
 0x2a8   :  { %226 = vrot.lane.b32.xlu1 %v224_v27, %s1447_s3 }
 0x31a   :  { %v227_v28 = vpop.permute.xlu1 %226 }
 0x31b   :  { %v229_v29 = vadd.f32 %v227_v28, %v223_v24 }
 0x31d   :  { %1322 = vtanh.f32 %v229_v29 }
 0x327   :  { %v1323_v31 = vpop.eup %1322 }
 0x328   :  { %v231_v32 = vmul.f32 %v1323_v31, %v1321_v23 }
 0x32a   :  { %241 = vrot.lane.b32.xlu1 %v231_v32, %s1447_s3 }
 0x39c   :  { %v242_v33 = vpop.permute.xlu1 %241 }
 0x39d   :  { %1099 = vmatmul.mubr.msk.f32.vlgmr.msra.gmra.mrb[0].mxu1 %vm133_vm1, %v242_v33 }
 0x39e   :  { %1196 = vmatpush1.bf16.msra.mxu1 %v1537_v38  ;;  %527 = vmatprep.mubr.f32.mxu1 %v1446_v4 }
 0x39f   :  { %1198 = vmatprep.subr.bf16.mxu1 %v1539_v39 }
 0x3a2   :  { %1200 = vmatpush1.bf16.msra.mxu1 %v1544_v44 }
 0x3a3   :  { %1202 = vmatprep.subr.bf16.mxu1 %v1548_v45 }
 0x3a6   :  { %1204 = vmatpush1.bf16.msra.mxu1 %v1552_v50 }
 0x3a7   :  { %1206 = vmatprep.subr.bf16.mxu1 %v1556_v51 }
 0x3aa   :  { %1208 = vmatpush1.bf16.msra.mxu1 %v1560_v54 }
 0x3ab   :  { %1226 = vmatprep.subr.bf16.mxu1 %v1535_v34 }
 0x470   :  { %v311_v42 = vpop.f32.mrb[0].mxu1 }
 0x471   :  { %v316_v43 = vadd.f32 %v311_v42, %v238_v40  ;;  %v313_v46 = vpop.f32.mrb[1].mxu1 }
 0x472   :  { %v317_v47 = vadd.f32 %v313_v46, %v239_v41  ;;  %v452_v41 = vpop.permute.xlu0 %451 }
 0x473   :  { %v1100_v48 = vmul.f32 -1.442695, %v316_v43  ;;  %v454_v42 = vmul.f32 %v452_v41, %v1522_v11  ;;  %v455_v43 = vmul.f32 %v452_v41, %v1524_v12 }
 0x474   :  { %v1101_v49 = vmul.f32 -1.442695, %v317_v47 }
 0x475   :  { %1324 = vpow2.f32 %v1100_v48  ;;  %v456_v46 = vadd.f32 %v454_v42, %v1526_v13  ;;  %v457_v47 = vadd.f32 %v455_v43, %v1528_v14 }
 0x476   :  { %1326 = vpow2.f32 %v1101_v49 }
 0x47f   :  { %v1325_v52 = vpop.eup %1324 }
 0x480   :  { %v1327_v53 = vpop.eup %1326  ;;  %v324_v56 = vadd.f32 1.0, %v1325_v52 }
 0x481   :  { %v325_v55 = vadd.f32 1.0, %v1327_v53 }
 0x483   :  { %1328 = vrcp.f32 %v325_v55 }
 0x484   :  { %1330 = vrcp.f32 %v324_v56 }
 0x48d   :  { %v1329_v57 = vpop.eup %1328 }
 0x48e   :  { %v330_v58 = vmul.f32 2.0, %v1329_v57  ;;  %v1331_v60 = vpop.eup %1330 }
 0x48f   :  { %v332_v62 = vmul.f32 %v1331_v60, %v229_v29 }
 0x490   :  { %v1102_v59 = vadd.f32 -1.0, %v330_v58 }
 0x492   :  { %v333_v61 = vmul.f32 %v1331_v60, %v1102_v59 }
 0x494   :  { %335 = vrot.lane.b32.xlu1 %v333_v61, %s1447_s3 }
 0x506   :  { %v336_v63 = vpop.permute.xlu1 %335 }
 0x507   :  { %v338_v0 = vadd.f32 %v336_v63, %v332_v62 }
 0x509   :  { %1332 = vtanh.f32 %v338_v0 }
 0x513   :  { %v1333_v3 = vpop.eup %1332 }
 0x514   :  { %v340_v5 = vmul.f32 %v1333_v3, %v1329_v57 }
 0x516   :  { %350 = vrot.lane.b32.xlu1 %v340_v5, %s1447_s3 }
 0x588   :  { %v351_v6 = vpop.permute.xlu1 %350 }
 0x589   :  { %1103 = vmatmul.mubr.msk.f32.vlgmr.msra.gmra.mrb[2].mxu0 %vm133_vm1, %v351_v6  ;;  %v1452_v6 = vmov 5  }
 0x58a   :  { %1212 = vmatpush1.bf16.msra.mxu0 %v1537_v38  ;;  %636 = vmatprep.mubr.f32.mxu0 %v1446_v4 }
 0x58b   :  { %1214 = vmatprep.subr.bf16.mxu0 %v1539_v39  ;;  %1301 = vset.pattern.permute.xlu0 %v1452_v6 }
 0x58c   :  { %560 = vperm.xlu0 %1301, %v1509_v1  }
 0x58e   :  { %1216 = vmatpush1.bf16.msra.mxu0 %v1544_v44 }
 0x58f   :  { %1218 = vmatprep.subr.bf16.mxu0 %v1548_v45 }
 0x592   :  { %1220 = vmatpush1.bf16.msra.mxu0 %v1552_v50 }
 0x593   :  { %1222 = vmatprep.subr.bf16.mxu0 %v1556_v51 }
 0x596   :  { %1224 = vmatpush1.bf16.msra.mxu0 %v1560_v54 }
 0x597   :  { %1242 = vmatprep.subr.bf16.mxu0 %v1535_v34 }
 0x65c   :  { %v420_v16 = vpop.f32.mrb[2].mxu0 }
 0x65d   :  { %v425_v17 = vadd.f32 %v420_v16, %v347_v10  ;;  %v422_v18 = vpop.f32.mrb[3].mxu0  ;;  %v561_v10 = vpop.permute.xlu0 %560 }
 0x65e   :  { %v426_v19 = vadd.f32 %v422_v18, %v348_v15  ;;  %v563_v15 = vmul.f32 %v561_v10, %v1522_v11  ;;  %v564_v16 = vmul.f32 %v561_v10, %v1524_v12 }
 0x65f   :  { %v1104_v20 = vmul.f32 -1.442695, %v425_v17 }
 0x660   :  { %v1105_v21 = vmul.f32 -1.442695, %v426_v19  ;;  %v565_v17 = vadd.f32 %v563_v15, %v1526_v13  ;;  %v566_v18 = vadd.f32 %v564_v16, %v1528_v14 }
 0x661   :  { %1334 = vpow2.f32 %v1104_v20 }
 0x662   :  { %1336 = vpow2.f32 %v1105_v21 }
 0x66b   :  { %v1335_v22 = vpop.eup %1334 }
 0x66c   :  { %v1337_v23 = vpop.eup %1336  ;;  %v433_v25 = vadd.f32 1.0, %v1335_v22 }
 0x66d   :  { %v434_v24 = vadd.f32 1.0, %v1337_v23 }
 0x66f   :  { %1338 = vrcp.f32 %v434_v24 }
 0x670   :  { %1340 = vrcp.f32 %v433_v25 }
 0x679   :  { %v1339_v26 = vpop.eup %1338 }
 0x67a   :  { %v439_v27 = vmul.f32 2.0, %v1339_v26  ;;  %v1341_v29 = vpop.eup %1340 }
 0x67b   :  { %v441_v31 = vmul.f32 %v1341_v29, %v338_v0 }
 0x67c   :  { %v1106_v28 = vadd.f32 -1.0, %v439_v27 }
 0x67e   :  { %v442_v30 = vmul.f32 %v1341_v29, %v1106_v28 }
 0x680   :  { %444 = vrot.lane.b32.xlu1 %v442_v30, %s1447_s3 }
 0x6f2   :  { %v445_v32 = vpop.permute.xlu1 %444 }
 0x6f3   :  { %v447_v33 = vadd.f32 %v445_v32, %v441_v31 }
 0x6f5   :  { %1342 = vtanh.f32 %v447_v33 }
 0x6ff   :  { %v1343_v36 = vpop.eup %1342 }
 0x700   :  { %v449_v37 = vmul.f32 %v1343_v36, %v1339_v26 }
 0x702   :  { %459 = vrot.lane.b32.xlu1 %v449_v37, %s1447_s3 }
 0x774   :  { %v460_v40 = vpop.permute.xlu1 %459 }
 0x775   :  { %1107 = vmatmul.mubr.msk.f32.vlgmr.msra.gmra.mrb[2].mxu1 %vm133_vm1, %v460_v40  ;;  %v1453_v40 = vmov 6  }
 0x776   :  { %1228 = vmatpush1.bf16.msra.mxu1 %v1537_v38  ;;  %745 = vmatprep.mubr.f32.mxu1 %v1446_v4 }
 0x777   :  { %1230 = vmatprep.subr.bf16.mxu1 %v1539_v39  ;;  %1302 = vset.pattern.permute.xlu0 %v1453_v40 }
 0x778   :  { %669 = vperm.xlu0 %1302, %v1509_v1  }
 0x77a   :  { %1232 = vmatpush1.bf16.msra.mxu1 %v1544_v44 }
 0x77b   :  { %1234 = vmatprep.subr.bf16.mxu1 %v1548_v45 }
 0x77e   :  { %1236 = vmatpush1.bf16.msra.mxu1 %v1552_v50 }
 0x77f   :  { %1238 = vmatprep.subr.bf16.mxu1 %v1556_v51 }
 0x782   :  { %1240 = vmatpush1.bf16.msra.mxu1 %v1560_v54 }
 0x783   :  { %1258 = vmatprep.subr.bf16.mxu1 %v1535_v34 }
 0x848   :  { %v529_v48 = vpop.f32.mrb[2].mxu1 }
 0x849   :  { %v534_v49 = vadd.f32 %v529_v48, %v456_v46  ;;  %v531_v52 = vpop.f32.mrb[3].mxu1  ;;  %v670_v46 = vpop.permute.xlu0 %669 }
 0x84a   :  { %v535_v53 = vadd.f32 %v531_v52, %v457_v47  ;;  %v672_v47 = vmul.f32 %v670_v46, %v1522_v11  ;;  %v673_v48 = vmul.f32 %v670_v46, %v1524_v12 }
 0x84b   :  { %v1108_v55 = vmul.f32 -1.442695, %v534_v49 }
 0x84c   :  { %v1109_v56 = vmul.f32 -1.442695, %v535_v53  ;;  %v675_v49 = vadd.f32 %v673_v48, %v1528_v14 }
 0x84d   :  { %1344 = vpow2.f32 %v1108_v55 }
 0x84e   :  { %1346 = vpow2.f32 %v1109_v56 }
 0x857   :  { %v1345_v57 = vpop.eup %1344 }
 0x858   :  { %v1347_v58 = vpop.eup %1346  ;;  %v542_v59 = vadd.f32 1.0, %v1345_v57 }
 0x859   :  { %v543_v34 = vadd.f32 1.0, %v1347_v58 }
 0x85b   :  { %1348 = vrcp.f32 %v543_v34 }
 0x85c   :  { %1350 = vrcp.f32 %v542_v59 }
 0x865   :  { %v1349_v60 = vpop.eup %1348 }
 0x866   :  { %v548_v61 = vmul.f32 2.0, %v1349_v60  ;;  %v1351_v63 = vpop.eup %1350 }
 0x867   :  { %v550_v2 = vmul.f32 %v1351_v63, %v447_v33 }
 0x868   :  { %v1110_v62 = vadd.f32 -1.0, %v548_v61 }
 0x86a   :  { %v551_v0 = vmul.f32 %v1351_v63, %v1110_v62 }
 0x86c   :  { %553 = vrot.lane.b32.xlu1 %v551_v0, %s1447_s3  ;;  %v1454_v0 = vmov 7  }
 0x86d   :  { %1303 = vset.pattern.permute.xlu0 %v1454_v0 }
 0x86e   :  { %778 = vperm.xlu0 %1303, %v1509_v1  }
 0x8de   :  { %v554_v3 = vpop.permute.xlu1 %553 }
 0x8df   :  { %v556_v5 = vadd.f32 %v554_v3, %v550_v2 }
 0x8e1   :  { %1352 = vtanh.f32 %v556_v5 }
 0x8eb   :  { %v1353_v7 = vpop.eup %1352 }
 0x8ec   :  { %v558_v8 = vmul.f32 %v1353_v7, %v1349_v60 }
 0x8ed   :  { %v779_v6 = vpop.permute.xlu0 %778 }
 0x8ee   :  { %568 = vrot.lane.b32.xlu1 %v558_v8, %s1447_s3  ;;  %v781_v7 = vmul.f32 %v779_v6, %v1522_v11  ;;  %v782_v8 = vmul.f32 %v779_v6, %v1524_v12 }
 0x8f0   :  { %v784_v10 = vadd.f32 %v782_v8, %v1528_v14 }
 0x960   :  { %v569_v9 = vpop.permute.xlu1 %568 }
 0x961   :  { %1111 = vmatmul.mubr.msk.f32.vlgmr.msra.gmra.mrb[4].mxu0 %vm133_vm1, %v569_v9  ;;  %v783_v9 = vadd.f32 %v781_v7, %v1526_v13 }
 0x962   :  { %1244 = vmatpush1.bf16.msra.mxu0 %v1537_v38  ;;  %854 = vmatprep.mubr.f32.mxu0 %v1446_v4 }
 0x963   :  { %1246 = vmatprep.subr.bf16.mxu0 %v1539_v39 }
 0x966   :  { %1248 = vmatpush1.bf16.msra.mxu0 %v1544_v44 }
 0x967   :  { %1250 = vmatprep.subr.bf16.mxu0 %v1548_v45 }
 0x96a   :  { %1252 = vmatpush1.bf16.msra.mxu0 %v1552_v50 }
 0x96b   :  { %1254 = vmatprep.subr.bf16.mxu0 %v1556_v51 }
 0x96e   :  { %1256 = vmatpush1.bf16.msra.mxu0 %v1560_v54 }
 0xa34   :  { %v638_v19 = vpop.f32.mrb[4].mxu0 }
 0xa35   :  { %v643_v20 = vadd.f32 %v638_v19, %v565_v17  ;;  %v640_v21 = vpop.f32.mrb[5].mxu0 }
 0xa36   :  { %v644_v22 = vadd.f32 %v640_v21, %v566_v18 }
 0xa37   :  { %v1112_v23 = vmul.f32 -1.442695, %v643_v20 }
 0xa38   :  { %v1113_v24 = vmul.f32 -1.442695, %v644_v22 }
 0xa39   :  { %1354 = vpow2.f32 %v1112_v23 }
 0xa3a   :  { %1356 = vpow2.f32 %v1113_v24 }
 0xa43   :  { %v1355_v25 = vpop.eup %1354 }
 0xa44   :  { %v1357_v26 = vpop.eup %1356  ;;  %v651_v28 = vadd.f32 1.0, %v1355_v25 }
 0xa45   :  { %v652_v27 = vadd.f32 1.0, %v1357_v26 }
 0xa47   :  { %1358 = vrcp.f32 %v652_v27 }
 0xa48   :  { %1360 = vrcp.f32 %v651_v28 }
 0xa51   :  { %v1359_v29 = vpop.eup %1358 }
 0xa52   :  { %v657_v30 = vmul.f32 2.0, %v1359_v29  ;;  %v1361_v32 = vpop.eup %1360 }
 0xa53   :  { %v659_v35 = vmul.f32 %v1361_v32, %v556_v5 }
 0xa54   :  { %v1114_v31 = vadd.f32 -1.0, %v657_v30 }
 0xa56   :  { %v660_v33 = vmul.f32 %v1361_v32, %v1114_v31 }
 0xa58   :  { %662 = vrot.lane.b32.xlu1 %v660_v33, %s1447_s3 }
 0xaca   :  { %v663_v36 = vpop.permute.xlu1 %662 }
 0xacb   :  { %v665_v37 = vadd.f32 %v663_v36, %v659_v35 }
 0xacd   :  { %1362 = vtanh.f32 %v665_v37 }
 0xad7   :  { %v1363_v41 = vpop.eup %1362 }
 0xad8   :  { %v667_v42 = vmul.f32 %v1363_v41, %v1359_v29 }
 0xada   :  { %677 = vrot.lane.b32.xlu1 %v667_v42, %s1447_s3 }
 0xb4c   :  { %v678_v43 = vpop.permute.xlu1 %677 }
 0xb4d   :  { %1115 = vmatmul.mubr.msk.f32.vlgmr.msra.gmra.mrb[4].mxu1 %vm133_vm1, %v678_v43 }
 0xb4e   :  { %1260 = vmatpush1.bf16.msra.mxu1 %v1537_v38  ;;  %955 = vmatprep.mubr.f32.mxu1 %v1446_v4  ;;  %v674_v38 = vadd.f32 %v672_v47, %v1526_v13 }
 0xb4f   :  { %1262 = vmatprep.subr.bf16.mxu1 %v1539_v39 }
 0xb52   :  { %1264 = vmatpush1.bf16.msra.mxu1 %v1544_v44 }
 0xb53   :  { %1266 = vmatprep.subr.bf16.mxu1 %v1548_v45 }
 0xb56   :  { %1268 = vmatpush1.bf16.msra.mxu1 %v1552_v50 }
 0xb57   :  { %1270 = vmatprep.subr.bf16.mxu1 %v1556_v51 }
 0xb5a   :  { %1272 = vmatpush1.bf16.msra.mxu1 %v1560_v54 }
 0xc20   :  { %v747_v39 = vpop.f32.mrb[4].mxu1 }
 0xc21   :  { %v752_v52 = vadd.f32 %v747_v39, %v674_v38  ;;  %v749_v44 = vpop.f32.mrb[5].mxu1 }
 0xc22   :  { %v753_v53 = vadd.f32 %v749_v44, %v675_v49  ;;  %v989_v44 = vld [vmem:[%s1714_s4 + $0x10] sm:$0xff] }
 0xc23   :  { %v1116_v45 = vmul.f32 -1.442695, %v752_v52 }
 0xc24   :  { %v1117_v55 = vmul.f32 -1.442695, %v753_v53  ;;  %v1455_v53 = vmov 0.0|0.0  }
 0xc25   :  { %1364 = vpow2.f32 %v1116_v45  ;;  %1273 = vmatprep.subr.bf16.mxu0 %v1455_v53 }
 0xc26   :  { %1366 = vpow2.f32 %v1117_v55  ;;  %v990_v55 = vld [vmem:[%s1714_s4 + $0x18] sm:$0xff] }
 0xc2f   :  { %v1365_v50 = vpop.eup %1364 }
 0xc30   :  { %v1367_v51 = vpop.eup %1366  ;;  %v760_v56 = vadd.f32 1.0, %v1365_v50  ;;  %v1277_v50 = vpack.c.bf16 %v990_v55, %v989_v44 }
 0xc31   :  { %v761_v54 = vadd.f32 1.0, %v1367_v51 }
 0xc33   :  { %1368 = vrcp.f32 %v761_v54 }
 0xc34   :  { %1370 = vrcp.f32 %v760_v56 }
 0xc3d   :  { %v1369_v57 = vpop.eup %1368 }
 0xc3e   :  { %v766_v58 = vmul.f32 2.0, %v1369_v57  ;;  %v1371_v59 = vpop.eup %1370 }
 0xc3f   :  { %v768_v61 = vmul.f32 %v1371_v59, %v665_v37 }
 0xc40   :  { %v1118_v34 = vadd.f32 -1.0, %v766_v58 }
 0xc42   :  { %v769_v60 = vmul.f32 %v1371_v59, %v1118_v34  ;;  %v1127_v59 = vld [vmem:[%s1715_s5] ss:$0 sm:$0xff] }
 0xc44   :  { %771 = vrot.lane.b32.xlu1 %v769_v60, %s1447_s3 }
 0xcb6   :  { %v772_v62 = vpop.permute.xlu1 %771 }
 0xcb7   :  { %v774_v63 = vadd.f32 %v772_v62, %v768_v61 }
 0xcb9   :  { %1372 = vtanh.f32 %v774_v63 }
 0xcc3   :  { %v1373_v2 = vpop.eup %1372 }
 0xcc4   :  { %v776_v3 = vmul.f32 %v1373_v2, %v1369_v57 }
 0xcc6   :  { %786 = vrot.lane.b32.xlu1 %v776_v3, %s1447_s3 }
 0xd38   :  { %v787_v5 = vpop.permute.xlu1 %786 }
 0xd39   :  { %1119 = vmatmul.mubr.msk.f32.vlgmr.msra.gmra.mrb[6].mxu0 %vm133_vm1, %v787_v5 }
 0xd3a   :  { %1142 = vmatprep.mubr.msk.f32.mxu0 %vm1456_vm2, %v1446_v4 }
 0xe0c   :  { %v856_v15 = vpop.f32.mrb[6].mxu0 }
 0xe0d   :  { %v861_v16 = vadd.f32 %v856_v15, %v783_v9  ;;  %v858_v17 = vpop.f32.mrb[7].mxu0 }
 0xe0e   :  { %v862_v1 = vadd.f32 %v858_v17, %v784_v10 }
 0xe0f   :  { %v1120_v18 = vmul.f32 -1.442695, %v861_v16 }
 0xe10   :  { %v1121_v19 = vmul.f32 -1.442695, %v862_v1 }
 0xe11   :  { %1374 = vpow2.f32 %v1120_v18 }
 0xe12   :  { %1376 = vpow2.f32 %v1121_v19 }
 0xe1b   :  { %v1375_v20 = vpop.eup %1374 }
 0xe1c   :  { %v1377_v21 = vpop.eup %1376  ;;  %v869_v23 = vadd.f32 1.0, %v1375_v20 }
 0xe1d   :  { %v870_v22 = vadd.f32 1.0, %v1377_v21 }
 0xe1f   :  { %1378 = vrcp.f32 %v870_v22 }
 0xe20   :  { %1380 = vrcp.f32 %v869_v23 }
 0xe29   :  { %v1379_v11 = vpop.eup %1378 }
 0xe2a   :  { %v875_v12 = vmul.f32 2.0, %v1379_v11  ;;  %v1381_v25 = vpop.eup %1380 }
 0xe2b   :  { %v877_v27 = vmul.f32 %v1381_v25, %v774_v63 }
 0xe2c   :  { %v1122_v24 = vadd.f32 -1.0, %v875_v12 }
 0xe2e   :  { %v878_v26 = vmul.f32 %v1381_v25, %v1122_v24 }
 0xe30   :  { %880 = vrot.lane.b32.xlu1 %v878_v26, %s1447_s3 }
 0xea2   :  { %v881_v28 = vpop.permute.xlu1 %880 }
 0xea3   :  { %v883_v29 = vadd.f32 %v881_v28, %v877_v27 }
 0xea5   :  { %1382 = vtanh.f32 %v883_v29 }
 0xeaf   :  { %v1383_v30 = vpop.eup %1382 }
 0xeb0   :  { %v885_v31 = vmul.f32 %v1383_v30, %v1379_v11 }
 0xeb2   :  { %887 = vrot.lane.b32.xlu1 %v885_v31, %s1447_s3 }
 0xf24   :  { %v888_v32 = vpop.permute.xlu1 %887 }
 0xf25   :  { %1123 = vmatmul.mubr.msk.f32.vlgmr.msra.gmra.mrb[6].mxu1 %vm133_vm1, %v888_v32 }
 0xff8   :  { %v957_v33 = vpop.f32.mrb[6].mxu1 }
 0xff9   :  { %v962_v35 = vadd.f32 %v957_v33, %v1526_v13  ;;  %v959_v36 = vpop.f32.mrb[7].mxu1  ;;  %v987_v13 = vld [vmem:[%s1714_s4] sm:$0xff] }
 0xffa   :  { %v963_v37 = vadd.f32 %v959_v36, %v1528_v14  ;;  %v988_v14 = vld [vmem:[%s1714_s4 + $0x8] sm:$0xff] }
 0xffb   :  { %v1124_v40 = vmul.f32 -1.442695, %v962_v35  ;;  %v1274_v45 = vpack.c.bf16 %v988_v14, %v987_v13 }
 0xffc   :  { %v1125_v41 = vmul.f32 -1.442695, %v963_v37 }
 0xffd   :  { %1384 = vpow2.f32 %v1124_v40  ;;  %1275 = vmatpush3.bf16.msra.mxu0 %v1274_v45 }
 0xffe   :  { %1386 = vpow2.f32 %v1125_v41  ;;  %1276 = vmatprep.subr.bf16.mxu0 %v1455_v53 }
0x1001   :  { %1278 = vmatpush3.bf16.msra.mxu0 %v1277_v50 }
0x1007   :  { %v1385_v42 = vpop.eup %1384 }
0x1008   :  { %v1387_v43 = vpop.eup %1386  ;;  %v970_v47 = vadd.f32 1.0, %v1385_v42 }
0x1009   :  { %v971_v46 = vadd.f32 1.0, %v1387_v43 }
0x100b   :  { %1388 = vrcp.f32 %v971_v46 }
0x100c   :  { %1390 = vrcp.f32 %v970_v47 }
0x1015   :  { %v1389_v48 = vpop.eup %1388 }
0x1016   :  { %v976_v38 = vmul.f32 2.0, %v1389_v48  ;;  %v1391_v39 = vpop.eup %1390 }
0x1017   :  { %v978_v51 = vmul.f32 %v1391_v39, %v883_v29 }
0x1018   :  { %v1126_v49 = vadd.f32 -1.0, %v976_v38 }
0x101a   :  { %v979_v52 = vmul.f32 %v1391_v39, %v1126_v49 }
0x101c   :  { %981 = vrot.lane.b32.xlu0 %v979_v52, %s1447_s3 }
0x108e   :  { %v982_v54 = vpop.permute.xlu0 %981 }
0x108f   :  { %v984_v56 = vadd.f32 %v982_v54, %v978_v51 }
0x1091   :  { %1392 = vtanh.f32 %v984_v56 }
0x109b   :  { %v1393_v57 = vpop.eup %1392 }
0x109c   :  { %v986_v58 = vmul.f32 %v1393_v57, %v1389_v48 }
0x109e   :  { %999 = vrot.lane.b32.xlu1 %v986_v58, %s1457_s22 }
0x1110   :  { %v1000_v34 = vpop.permute.xlu1 %999 }
0x1111   :  { %1143 = vmatmul.mubr.msk.f32.vlgmr.msra.gmra.mrb[8].mxu0 %vm1001_vm3, %v1000_v34 }
0x11e4   :  { %v1070_v4 = vpop.f32.mrb[8].mxu0 }
0x11e5   :  { %v1071_v60 = vadd.f32 %v1127_v59, %v1070_v4  ;;  %v1144_v61 = vpop.f32.mrb[9].mxu0 }
0x11e7   :  { %1075 = vst.msk [vmem:[#allocation5] sm:$0xf] %vm1074_vm4, %v1071_v60 }
0x11e8   :  { %1427 = shalt.err (!%p1424_p12)
}
0x11e9   :  { %s1428_s29 = scalar_lea.hbm %s1716_s6, 64 }
0x11ea   :  { %p1429_p13 = scmp.ne.s32.totalorder %s1716_s6, %s1428_s29  ;;  %p1432_p0 = scmp.lt.u32.totalorder %s1428_s29, %s1716_s6 }
0x11ec   :  { %p1434_p1 = pnand %p1432_p0, %p1429_p13 }
0x11ee   :  { %1437 = shalt.err (!%p1434_p1)
}
0x11ef   :  { %1085 = dma.vmem_to_hbm [thread:$0]  %s1083_s25, 64, %s1716_s6, [#allocation4]  }
0x11f0   :  { %1440 = dma.done.wait [#allocation4], 64  }
0x11f1   :  { %1441 = vsyncadd [#allocation4], 4294967232 }
0x11f2   :  { %1089 = vsyncpa [#allocation3], 1 }
0x11f3   :  { %1090 = vsyncpa [#allocation4], 1 }

</bundles_post_ra>
